<compile_context>
chip_gen: v5e
topology: v5e:2x2
jax: 0.10.0
libtpu: 0.0.40
codegen_flags: <defaults>
</compile_context>

<pallas_src>
import functools

import jax
import jax.numpy as jnp
from jax.experimental import pallas as pl
from jax.experimental.pallas import tpu as pltpu


def _round_up(x, m):
    return (x + m - 1) // m * m


def _mlp_kernel(x_ref, w_ref, b_ref, gamma_ref, beta_ref, o_ref, acc_ref, *, eps, hid):
    # x_ref:     (TM, TK)        row tile of the (padded) input
    # w_ref:     (TK, HID_PAD)   K-slice of the (padded, transposed) weight
    # b_ref:     (1, HID_PAD)    linear bias   (f32, zero-padded)
    # gamma_ref: (1, HID_PAD)    LayerNorm weight (f32, zero-padded)
    # beta_ref:  (1, HID_PAD)    LayerNorm bias   (f32, zero-padded)
    # o_ref:     (TM, HID_PAD)   output tile
    # acc_ref:   (TM, HID_PAD)   f32 matmul accumulator (VMEM scratch)
    k = pl.program_id(1)

    @pl.when(k == 0)
    def _():
        acc_ref[...] = jnp.zeros_like(acc_ref)

    # MXU matmul in native input dtype with f32 accumulation.
    acc_ref[...] += jnp.dot(x_ref[...], w_ref[...], preferred_element_type=jnp.float32)

    @pl.when(k == pl.num_programs(1) - 1)
    def _():
        h = acc_ref[...] + b_ref[...]  # (TM, HID_PAD), f32
        # Padded hidden columns of h are exactly zero (zero-padded W and b), so a
        # single fused sum / sum-of-squares pass over the padded lane width divided
        # by the true `hid` yields the correct LayerNorm mean / variance.
        inv_hid = jnp.float32(1.0 / hid)
        s = jnp.sum(h, axis=-1, keepdims=True)
        ss = jnp.sum(h * h, axis=-1, keepdims=True)
        mean = s * inv_hid
        var = jnp.maximum(ss * inv_hid - mean * mean, 0.0)
        inv_std = jax.lax.rsqrt(var + jnp.float32(eps))
        hn = (h - mean) * inv_std * gamma_ref[...] + beta_ref[...]

        # Dropout: eval-mode identity.
        # TODO(synk): training-mode dropout (hidden_dropout_prob) not implemented;
        # inference semantics only.

        # GELU, exact erf form (matches transformers.GELUActivation). The tanh
        # approximation would route to the EUP (cheaper on v5e) but deviates ~1e-3.
        out = 0.5 * hn * (1.0 + jax.lax.erf(hn * jnp.float32(0.7071067811865476)))
        o_ref[...] = out.astype(o_ref.dtype)


def mlp_forward(x, w, b, gamma, beta, *, eps=1e-12, tm=256, tk=512):
    """x: [..., input_dim] -> [..., hidden_size] (linear -> layernorm -> gelu)."""
    in_dim = x.shape[-1]
    hid = w.shape[0]  # PyTorch-style weight: (hidden, input)
    lead = x.shape[:-1]
    x2 = x.reshape(-1, in_dim)
    n = x2.shape[0]

    # Lane-dense padding (multiples of 128 on last dims) + row/K tile padding.
    hid_pad = _round_up(hid, 128)
    tk_eff = min(tk, _round_up(in_dim, 128))
    in_pad = _round_up(in_dim, tk_eff)
    tm_eff = min(tm, _round_up(n, 8))
    n_pad = _round_up(n, tm_eff)

    x2p = jnp.pad(x2, ((0, n_pad - n), (0, in_pad - in_dim)))
    w_t = jnp.pad(w.T, ((0, in_pad - in_dim), (0, hid_pad - hid)))  # (in_pad, hid_pad)
    b2 = jnp.pad(b.astype(jnp.float32), (0, hid_pad - hid)).reshape(1, hid_pad)
    g2 = jnp.pad(gamma.astype(jnp.float32), (0, hid_pad - hid)).reshape(1, hid_pad)
    be2 = jnp.pad(beta.astype(jnp.float32), (0, hid_pad - hid)).reshape(1, hid_pad)

    row_steps = n_pad // tm_eff
    k_steps = in_pad // tk_eff
    w_bufs = 1 if k_steps == 1 else 2  # constant block -> single buffer

    # Explicit scoped-VMEM budget: weight bufs + double-buffered x/out tiles +
    # small vectors + accumulator + slack.
    isz = lambda a: jnp.dtype(a.dtype).itemsize
    vmem_bytes = (
        w_bufs * tk_eff * hid_pad * isz(w_t)
        + 2 * tm_eff * tk_eff * isz(x2p)
        + 2 * tm_eff * hid_pad * isz(x)
        + 3 * hid_pad * 4
        + tm_eff * hid_pad * 4
        + (4 << 20)
    )
    vmem_bytes = int(min(vmem_bytes, 128 << 20))

    kernel = functools.partial(_mlp_kernel, eps=eps, hid=hid)

    out = pl.pallas_call(
        kernel,
        out_shape=jax.ShapeDtypeStruct((n_pad, hid_pad), x.dtype),
        grid_spec=pltpu.PrefetchScalarGridSpec(
            num_scalar_prefetch=0,
            grid=(row_steps, k_steps),
            in_specs=[
                pl.BlockSpec((tm_eff, tk_eff), lambda i, k: (i, k)),
                pl.BlockSpec((tk_eff, hid_pad), lambda i, k: (k, 0),
                             pipeline_mode=pl.Buffered(w_bufs)),
                pl.BlockSpec((1, hid_pad), lambda i, k: (0, 0),
                             pipeline_mode=pl.Buffered(1)),
                pl.BlockSpec((1, hid_pad), lambda i, k: (0, 0),
                             pipeline_mode=pl.Buffered(1)),
                pl.BlockSpec((1, hid_pad), lambda i, k: (0, 0),
                             pipeline_mode=pl.Buffered(1)),
            ],
            out_specs=pl.BlockSpec((tm_eff, hid_pad), lambda i, k: (i, 0)),
            scratch_shapes=[pltpu.VMEM((tm_eff, hid_pad), jnp.float32)],
        ),
        compiler_params=pltpu.CompilerParams(
            dimension_semantics=("parallel", "arbitrary"),  # row tiles shard across TCs (v7x)
            vmem_limit_bytes=vmem_bytes,
        ),
    )(x2p, w_t, b2, g2, be2)

    return out[:n, :hid].reshape(*lead, hid)


def _reference(x, w, b, gamma, beta, eps):
    h = jnp.einsum("...i,oi->...o", x, w) + b
    mean = jnp.mean(h, axis=-1, keepdims=True)
    var = jnp.mean((h - mean) ** 2, axis=-1, keepdims=True)
    hn = (h - mean) / jnp.sqrt(var + eps)
    hn = hn * gamma + beta
    return 0.5 * hn * (1.0 + jax.lax.erf(hn / jnp.sqrt(2.0)))


if __name__ == "__main__":
    # config: input_dim=16, hidden_size=32, layer_norm_eps=1e-12, dropout in eval mode
    batch, seq, input_dim, hidden_size = 2, 8, 16, 32
    eps = 1e-12

    key = jax.random.PRNGKey(0)
    kx, kw, kb, kg, kbe = jax.random.split(key, 5)

    x = jax.random.normal(kx, (batch, seq, input_dim), dtype=jnp.float32)
    w = jax.random.normal(kw, (hidden_size, input_dim), dtype=jnp.float32) * 0.1
    b = jax.random.normal(kb, (hidden_size,), dtype=jnp.float32) * 0.1
    gamma = jnp.ones((hidden_size,), dtype=jnp.float32) + 0.05 * jax.random.normal(
        kg, (hidden_size,), dtype=jnp.float32
    )
    beta = 0.05 * jax.random.normal(kbe, (hidden_size,), dtype=jnp.float32)

    out = mlp_forward(x, w, b, gamma, beta, eps=eps)
    out = jax.block_until_ready(out)

    ref = _reference(x, w, b, gamma, beta, eps)
    assert out.shape == (batch, seq, hidden_size)
    assert jnp.allclose(out, ref, atol=1e-4, rtol=1e-4), "mismatch vs reference"

    print("KERNEL_OK")
</pallas_src>

<mosaic_0001>
module attributes {stable_mosaic.version = 11 : i64} {
  func.func @_mlp_kernel(%arg0: i32, %arg1: i32, %arg2: memref<16x128xf32, #tpu.memory_space<vmem>>, %arg3: memref<128x128xf32, #tpu.memory_space<vmem>>, %arg4: memref<1x128xf32, #tpu.memory_space<vmem>>, %arg5: memref<1x128xf32, #tpu.memory_space<vmem>>, %arg6: memref<1x128xf32, #tpu.memory_space<vmem>>, %arg7: memref<16x128xf32, #tpu.memory_space<vmem>>, %arg8: memref<16x128xf32, #tpu.memory_space<vmem>>) attributes {dimension_semantics = [#tpu.dimension_semantics<parallel>, #tpu.dimension_semantics<arbitrary>], iteration_bounds = array<i64: 1, 1>, scalar_prefetch = 0 : i64, scratch_operands = 1 : i64, tpu.core_type = #tpu.core_type<tc>, window_params = [{transform_indices = @transform_0, window_bounds = array<i64: 16, 128>}, {pipeline_mode = #tpu.pipeline_mode<synchronous>, transform_indices = @transform_1, window_bounds = array<i64: 128, 128>}, {pipeline_mode = #tpu.pipeline_mode<synchronous>, transform_indices = @transform_2, window_bounds = array<i64: 1, 128>}, {pipeline_mode = #tpu.pipeline_mode<synchronous>, transform_indices = @transform_3, window_bounds = array<i64: 1, 128>}, {pipeline_mode = #tpu.pipeline_mode<synchronous>, transform_indices = @transform_4, window_bounds = array<i64: 1, 128>}, {transform_indices = @transform_5, window_bounds = array<i64: 16, 128>}]} {
    %c0_i32 = arith.constant 0 : i32
    %0 = arith.cmpi eq, %arg1, %c0_i32 : i32
    %1 = arith.extui %0 : i1 to i32
    %c0_i32_0 = arith.constant 0 : i32
    %2 = arith.cmpi ne, %1, %c0_i32_0 : i32
    scf.if %2 {
      %cst_10 = arith.constant 0.000000e+00 : f32
      %12 = vector.broadcast %cst_10 : f32 to vector<16x128xf32>
      %c0_11 = arith.constant 0 : index
      %c0_12 = arith.constant 0 : index
      %13 = vector.load %arg8[%c0_11, %c0_12] : memref<16x128xf32, #tpu.memory_space<vmem>>, vector<16x128xf32>
      tpu.vector_store %arg8[%c0_11, %c0_12], %12 {strides = array<i32>} : memref<16x128xf32, #tpu.memory_space<vmem>>, vector<16x128xf32>,
    } else {
    }
    %c0 = arith.constant 0 : index
    %c0_1 = arith.constant 0 : index
    %3 = vector.load %arg8[%c0, %c0_1] : memref<16x128xf32, #tpu.memory_space<vmem>>, vector<16x128xf32>
    %c0_2 = arith.constant 0 : index
    %c0_3 = arith.constant 0 : index
    %4 = vector.load %arg2[%c0_2, %c0_3] : memref<16x128xf32, #tpu.memory_space<vmem>>, vector<16x128xf32>
    %c0_4 = arith.constant 0 : index
    %c0_5 = arith.constant 0 : index
    %5 = vector.load %arg3[%c0_4, %c0_5] : memref<128x128xf32, #tpu.memory_space<vmem>>, vector<128x128xf32>
    %cst = arith.constant dense<0.000000e+00> : vector<16x128xf32>
    %6 = tpu.matmul %4, %5, %cst {dimension_numbers = #tpu.dot_dimension_numbers<[1], [0], [0], [1], [0, 0, 1, 1], [], []>} : vector<16x128xf32>, vector<128x128xf32>, vector<16x128xf32> -> vector<16x128xf32>
    %7 = arith.addf %3, %6 : vector<16x128xf32>
    %c0_6 = arith.constant 0 : index
    %c0_7 = arith.constant 0 : index
    %8 = vector.load %arg8[%c0_6, %c0_7] : memref<16x128xf32, #tpu.memory_space<vmem>>, vector<16x128xf32>
    tpu.vector_store %arg8[%c0_6, %c0_7], %7 {strides = array<i32>} : memref<16x128xf32, #tpu.memory_space<vmem>>, vector<16x128xf32>,
    %c0_i32_8 = arith.constant 0 : i32
    %9 = arith.cmpi eq, %arg1, %c0_i32_8 : i32
    %10 = arith.extui %9 : i1 to i32
    %c0_i32_9 = arith.constant 0 : i32
    %11 = arith.cmpi ne, %10, %c0_i32_9 : i32
    scf.if %11 {
      %c0_10 = arith.constant 0 : index
      %c0_11 = arith.constant 0 : index
      %12 = vector.load %arg8[%c0_10, %c0_11] : memref<16x128xf32, #tpu.memory_space<vmem>>, vector<16x128xf32>
      %c0_12 = arith.constant 0 : index
      %c0_13 = arith.constant 0 : index
      %13 = vector.load %arg4[%c0_12, %c0_13] : memref<1x128xf32, #tpu.memory_space<vmem>>, vector<1x128xf32>
      %14 = vector.broadcast %13 : vector<1x128xf32> to vector<16x128xf32>
      %15 = arith.addf %12, %14 : vector<16x128xf32>
      %cst_14 = arith.constant dense<0.000000e+00> : vector<16xf32>
      %16 = vector.multi_reduction <add>, %15, %cst_14 [1] : vector<16x128xf32> to vector<16xf32>
      %17 = vector.shape_cast %16 : vector<16xf32> to vector<16x1xf32>
      %18 = arith.mulf %15, %15 : vector<16x128xf32>
      %cst_15 = arith.constant dense<0.000000e+00> : vector<16xf32>
      %19 = vector.multi_reduction <add>, %18, %cst_15 [1] : vector<16x128xf32> to vector<16xf32>
      %20 = vector.shape_cast %19 : vector<16xf32> to vector<16x1xf32>
      %cst_16 = arith.constant 3.125000e-02 : f32
      %21 = vector.broadcast %cst_16 : f32 to vector<16x1xf32>
      %22 = arith.mulf %17, %21 : vector<16x1xf32>
      %cst_17 = arith.constant 3.125000e-02 : f32
      %23 = vector.broadcast %cst_17 : f32 to vector<16x1xf32>
      %24 = arith.mulf %20, %23 : vector<16x1xf32>
      %25 = arith.mulf %22, %22 : vector<16x1xf32>
      %26 = arith.subf %24, %25 : vector<16x1xf32>
      %cst_18 = arith.constant 0.000000e+00 : f32
      %27 = vector.broadcast %cst_18 : f32 to vector<16x1xf32>
      %28 = arith.maximumf %26, %27 : vector<16x1xf32>
      %cst_19 = arith.constant 9.99999996E-13 : f32
      %29 = vector.broadcast %cst_19 : f32 to vector<16x1xf32>
      %30 = arith.addf %28, %29 : vector<16x1xf32>
      %31 = math.rsqrt %30 : vector<16x1xf32>
      %32 = vector.broadcast %22 : vector<16x1xf32> to vector<16x128xf32>
      %33 = arith.subf %15, %32 : vector<16x128xf32>
      %34 = vector.broadcast %31 : vector<16x1xf32> to vector<16x128xf32>
      %35 = arith.mulf %33, %34 : vector<16x128xf32>
      %c0_20 = arith.constant 0 : index
      %c0_21 = arith.constant 0 : index
      %36 = vector.load %arg5[%c0_20, %c0_21] : memref<1x128xf32, #tpu.memory_space<vmem>>, vector<1x128xf32>
      %37 = vector.broadcast %36 : vector<1x128xf32> to vector<16x128xf32>
      %38 = arith.mulf %35, %37 : vector<16x128xf32>
      %c0_22 = arith.constant 0 : index
      %c0_23 = arith.constant 0 : index
      %39 = vector.load %arg6[%c0_22, %c0_23] : memref<1x128xf32, #tpu.memory_space<vmem>>, vector<1x128xf32>
      %40 = vector.broadcast %39 : vector<1x128xf32> to vector<16x128xf32>
      %41 = arith.addf %38, %40 : vector<16x128xf32>
      %cst_24 = arith.constant 5.000000e-01 : f32
      %42 = vector.broadcast %cst_24 : f32 to vector<16x128xf32>
      %43 = arith.mulf %42, %41 : vector<16x128xf32>
      %cst_25 = arith.constant 0.707106769 : f32
      %44 = vector.broadcast %cst_25 : f32 to vector<16x128xf32>
      %45 = arith.mulf %41, %44 : vector<16x128xf32>
      %46 = math.erf %45 : vector<16x128xf32>
      %cst_26 = arith.constant 1.000000e+00 : f32
      %47 = vector.broadcast %cst_26 : f32 to vector<16x128xf32>
      %48 = arith.addf %47, %46 : vector<16x128xf32>
      %49 = arith.mulf %43, %48 : vector<16x128xf32>
      %c0_27 = arith.constant 0 : index
      %c0_28 = arith.constant 0 : index
      %50 = vector.load %arg7[%c0_27, %c0_28] : memref<16x128xf32, #tpu.memory_space<vmem>>, vector<16x128xf32>
      tpu.vector_store %arg7[%c0_27, %c0_28], %49 {strides = array<i32>} : memref<16x128xf32, #tpu.memory_space<vmem>>, vector<16x128xf32>,
    } else {
    }
    return
  }
  func.func @transform_0(%arg0: i32, %arg1: i32) -> (i32, i32) {
    %c0_i32 = arith.constant 0 : i32
    return %arg0, %arg1 : i32, i32
  }
  func.func @transform_1(%arg0: i32, %arg1: i32) -> (i32, i32) {
    %c0_i32 = arith.constant 0 : i32
    %c0_i32_0 = arith.constant 0 : i32
    return %arg1, %c0_i32 : i32, i32
  }
  func.func @transform_2(%arg0: i32, %arg1: i32) -> (i32, i32) {
    %c0_i32 = arith.constant 0 : i32
    %c0_i32_0 = arith.constant 0 : i32
    %c0_i32_1 = arith.constant 0 : i32
    return %c0_i32, %c0_i32_0 : i32, i32
  }
  func.func @transform_3(%arg0: i32, %arg1: i32) -> (i32, i32) {
    %c0_i32 = arith.constant 0 : i32
    %c0_i32_0 = arith.constant 0 : i32
    %c0_i32_1 = arith.constant 0 : i32
    return %c0_i32, %c0_i32_0 : i32, i32
  }
  func.func @transform_4(%arg0: i32, %arg1: i32) -> (i32, i32) {
    %c0_i32 = arith.constant 0 : i32
    %c0_i32_0 = arith.constant 0 : i32
    %c0_i32_1 = arith.constant 0 : i32
    return %c0_i32, %c0_i32_0 : i32, i32
  }
  func.func @transform_5(%arg0: i32, %arg1: i32) -> (i32, i32) {
    %c0_i32 = arith.constant 0 : i32
    %c0_i32_0 = arith.constant 0 : i32
    return %arg0, %c0_i32 : i32, i32
  }
}

</mosaic_0001>

<bundles_post_ra>
// kernel: tpu_custom_call.1
= control target key start
LH: loop header
LB: loop body
LE: loop exit
PB: predicated region body
PF: predicated region fallthrough
CT: control target
= control target key end

     0   :  { %10 = vsyncpa [#allocation4], 0  ;;  %s477_s0 = inlined_call_operand.hbm [shape: f32[16,128], index: 0, kind: input, shape index: {}]   ;;  %s478_s1 = inlined_call_operand.hbm [shape: f32[128,128], index: 1, kind: input, shape index: {}]   ;;  %s479_s2 = inlined_call_operand.vmem [shape: f32[1,128], index: 2, kind: input, shape index: {}]   ;;  %s480_s3 = inlined_call_operand.vmem [shape: f32[1,128], index: 3, kind: input, shape index: {}]   ;;  %s481_s4 = inlined_call_operand.vmem [shape: f32[1,128], index: 4, kind: input, shape index: {}]   ;;  %s482_s5 = inlined_call_operand.hbm [shape: f32[16,128], index: 5, kind: output, shape index: {}]  }
   0x1   :  { %11 = vsyncpa [#allocation7], 0 }
   0x2   :  { %12 = vsyncpa [#allocation5], 0  ;;  %s17_s20 = sshll.u32 %s477_s0, 4  ;;  %s397_s21 = smov [#allocation3]   ;;  %s18_s20 = int_to_ptr.hbm [resolvable:$true] %s17_s20 }
   0x3   :  { %s19_s22 = sshll.u32 %s397_s21, 4  ;;  %s30_s25 = sshll.u32 %s478_s1, 4  ;;  %s20_s22 = int_to_ptr.vmem [resolvable:$true] %s19_s22  ;;  %s31_s25 = int_to_ptr.hbm [resolvable:$true] %s30_s25 }
   0x4   :  { %s398_s26 = smov 128   ;;  %s399_s27 = smov 8  }
   0x5   :  { %25 = dma.hbm_to_vmem [thread:$0]  %s18_s20, 256, %s20_s22, [#allocation4], %s398_s26, %s398_s26, %s399_s27  }
   0x6   :  { %s400_s28 = smov [#allocation6]  }
   0x7   :  { %s32_s29 = sshll.u32 %s400_s28, 4  ;;  %s33_s29 = int_to_ptr.vmem [resolvable:$true] %s32_s29 }
   0x8   :  { %38 = dma.hbm_to_vmem [thread:$0]  %s31_s25, 2048, %s33_s29, [#allocation7], %s398_s26, %s398_s26, %s399_s27  }
   0x9   :  { %391 = dma.done.wait [#allocation4], 256  }
   0xa   :  { %392 = vsyncadd [#allocation4], 4294967040 }
   0xb   :  { %393 = dma.done.wait [#allocation7], 2048  }
   0xc   :  { %394 = vsyncadd [#allocation7], 4294965248  ;;  %v78_v0 = vld [vmem:[#allocation6 + $0x78] sm:$0xff]  ;;  %v77_v1 = vld [vmem:[#allocation6 + $0x70] sm:$0xff]  ;;  %s271_s10 = sshll.u32 %s482_s5, 4  ;;  %s272_s10 = int_to_ptr.hbm [resolvable:$true] %s271_s10 }
   0xd   :  { %79 = vmatpush.msra.mxu0 %v78_v0  ;;  %287 = vmatpush.msra.mxu1 %v78_v0  ;;  %v76_v2 = vld [vmem:[#allocation6 + $0x68] sm:$0xff]  ;;  %v75_v3 = vld [vmem:[#allocation6 + $0x60] sm:$0xff]  ;;  %v74_v4 = vld [vmem:[#allocation6 + $0x58] sm:$0xff] }
   0xe   :  { %v73_v5 = vld [vmem:[#allocation6 + $0x50] sm:$0xff]  ;;  %v72_v6 = vld [vmem:[#allocation6 + $0x48] sm:$0xff]  ;;  %v71_v7 = vld [vmem:[#allocation6 + $0x40] sm:$0xff] }
   0xf   :  { %80 = vmatpush.msra.mxu0 %v77_v1  ;;  %288 = vmatpush.msra.mxu1 %v77_v1  ;;  %v70_v8 = vld [vmem:[#allocation6 + $0x38] sm:$0xff]  ;;  %v69_v9 = vld [vmem:[#allocation6 + $0x30] sm:$0xff]  ;;  %v68_v10 = vld [vmem:[#allocation6 + $0x28] sm:$0xff] }
  0x10   :  { %v67_v11 = vld [vmem:[#allocation6 + $0x20] sm:$0xff]  ;;  %v66_v12 = vld [vmem:[#allocation6 + $0x18] sm:$0xff]  ;;  %v65_v13 = vld [vmem:[#allocation6 + $0x10] sm:$0xff] }
  0x11   :  { %81 = vmatpush.msra.mxu0 %v76_v2  ;;  %289 = vmatpush.msra.mxu1 %v76_v2  ;;  %v64_v14 = vld [vmem:[#allocation6 + $0x8] sm:$0xff]  ;;  %v63_v15 = vld [vmem:[#allocation6] sm:$0xff]  ;;  %v61_v16 = vld [vmem:[#allocation3] sm:$0xff] }
  0x12   :  { %v62_v17 = vld [vmem:[#allocation3 + $0x8] sm:$0xff]  ;;  %v308_v18 = vld [vmem:[%s479_s2] ss:$0 sm:$0xff] }
  0x13   :  { %82 = vmatpush.msra.mxu0 %v75_v3  ;;  %290 = vmatpush.msra.mxu1 %v75_v3  ;;  %v309_v49 = vld [vmem:[%s480_s3] ss:$0 sm:$0xff]  ;;  %s401_s3 = smov [#allocation8]  }
  0x14   :  { %v310_v54 = vld [vmem:[%s481_s4] ss:$0 sm:$0xff]  ;;  %s269_s4 = sshll.u32 %s401_s3, 4  ;;  %s270_s4 = int_to_ptr.vmem [resolvable:$true] %s269_s4 }
  0x15   :  { %83 = vmatpush.msra.mxu0 %v74_v4  ;;  %291 = vmatpush.msra.mxu1 %v74_v4 }
  0x17   :  { %84 = vmatpush.msra.mxu0 %v73_v5  ;;  %292 = vmatpush.msra.mxu1 %v73_v5 }
  0x19   :  { %85 = vmatpush.msra.mxu0 %v72_v6  ;;  %293 = vmatpush.msra.mxu1 %v72_v6 }
  0x1b   :  { %86 = vmatpush.msra.mxu0 %v71_v7  ;;  %294 = vmatpush.msra.mxu1 %v71_v7 }
  0x1d   :  { %87 = vmatpush.msra.mxu0 %v70_v8  ;;  %295 = vmatpush.msra.mxu1 %v70_v8 }
  0x1f   :  { %88 = vmatpush.msra.mxu0 %v69_v9  ;;  %296 = vmatpush.msra.mxu1 %v69_v9 }
  0x21   :  { %89 = vmatpush.msra.mxu0 %v68_v10  ;;  %297 = vmatpush.msra.mxu1 %v68_v10 }
  0x23   :  { %90 = vmatpush.msra.mxu0 %v67_v11  ;;  %298 = vmatpush.msra.mxu1 %v67_v11 }
  0x25   :  { %91 = vmatpush.msra.mxu0 %v66_v12  ;;  %299 = vmatpush.msra.mxu1 %v66_v12 }
  0x27   :  { %92 = vmatpush.msra.mxu0 %v65_v13  ;;  %300 = vmatpush.msra.mxu1 %v65_v13 }
  0x29   :  { %93 = vmatpush.msra.mxu0 %v64_v14  ;;  %301 = vmatpush.msra.mxu1 %v64_v14 }
  0x2b   :  { %94 = vmatpush.msra.mxu0 %v63_v15  ;;  %302 = vmatpush.msra.mxu1 %v63_v15 }
  0x2c   :  { %95 = vmatmul.f32.vlgmr.msra.gmra.mxu0 %v61_v16  ;;  %98 = vmatmul.f32.vlgmr.msra.gmra.mxu1 %v62_v17 }
  0xa9   :  { %v96_v19 = vpop.f32.mrf.mxu0  ;;  %v99_v21 = vpop.f32.mrf.mxu1 }
  0xaa   :  { %v115_v20 = vadd.f32 %v308_v18, %v96_v19  ;;  %v116_v23 = vadd.f32 %v308_v18, %v99_v21 }
  0xac   :  { %117 = vadd.xlane.f32.xlu0 %v115_v20  ;;  %v121_v22 = vmul.f32 %v115_v20, %v115_v20  ;;  %v122_v24 = vmul.f32 %v116_v23, %v116_v23 }
  0xae   :  { %123 = vadd.xlane.f32.xlu1 %v121_v22 }
  0xb4   :  { %119 = vadd.xlane.f32.xlu0 %v116_v23 }
  0xb6   :  { %125 = vadd.xlane.f32.xlu1 %v122_v24 }
 0x11f   :  { %v118_v25 = vpop.xlane.xlu0 %117 }
 0x120   :  { %v127_v26 = vmul.f32 0.03125, %v118_v25 }
 0x121   :  { %v124_v27 = vpop.xlane.xlu1 %123 }
 0x122   :  { %v131_v28 = vmul.f32 %v127_v26, %v127_v26  ;;  %v129_v29 = vmul.f32 0.03125, %v124_v27  ;;  %v159_v48 = vsub.f32 %v115_v20, %v127_v26 }
 0x124   :  { %v133_v30 = vsub.f32 %v129_v29, %v131_v28 }
 0x126   :  { %v135_v31 = vmax.f32 %v133_v30, 0.0 }
 0x127   :  { %v120_v32 = vpop.xlane.xlu0 %119 }
 0x128   :  { %v137_v33 = vadd.f32 1e-12, %v135_v31  ;;  %v128_v34 = vmul.f32 0.03125, %v120_v32 }
 0x129   :  { %v126_v35 = vpop.xlane.xlu1 %125 }
 0x12a   :  { %311 = vrsqrt.f32 %v137_v33  ;;  %v132_v36 = vmul.f32 %v128_v34, %v128_v34  ;;  %v130_v37 = vmul.f32 0.03125, %v126_v35  ;;  %vm145_vm1 = vweird.f32 %v137_v33 }
 0x12b   :  { %v160_v61 = vsub.f32 %v116_v23, %v128_v34 }
 0x12c   :  { %v134_v38 = vsub.f32 %v130_v37, %v132_v36 }
 0x12e   :  { %v136_v39 = vmax.f32 %v134_v38, 0.0 }
 0x130   :  { %v312_v40 = vpop.eup %311  ;;  %v138_v42 = vadd.f32 1e-12, %v136_v39 }
 0x131   :  { %v140_v41 = vmul.f32 %v312_v40, %v137_v33  ;;  %vm146_vm0 = vweird.f32 %v312_v40 }
 0x132   :  { %313 = vrsqrt.f32 %v138_v42  ;;  %vm147_vm2 = vmor %vm145_vm1, %vm146_vm0  ;;  %vm155_vm4 = vweird.f32 %v138_v42 }
 0x133   :  { %v141_v43 = vmul.f32 %v312_v40, %v140_v41 }
 0x135   :  { %v142_v44 = vmul.f32 0.5, %v141_v43 }
 0x137   :  { %v143_v45 = vsub.f32 1.5, %v142_v44 }
 0x138   :  { %v314_v46 = vpop.eup %313 }
 0x139   :  { %v144_v47 = vmul.f32 %v312_v40, %v143_v45  ;;  %v150_v50 = vmul.f32 %v314_v46, %v138_v42  ;;  %vm156_vm3 = vweird.f32 %v314_v46 }
 0x13a   :  { %vm157_vm5 = vmor %vm155_vm4, %vm156_vm3 }
 0x13b   :  { %v148_v51 = vsel %vm147_vm2, %v312_v40, %v144_v47  ;;  %v151_v53 = vmul.f32 %v314_v46, %v150_v50 }
 0x13c   :  { %v161_v52 = vmul.f32 %v159_v48, %v148_v51 }
 0x13d   :  { %v152_v55 = vmul.f32 0.5, %v151_v53 }
 0x13e   :  { %v167_v56 = vmul.f32 %v309_v49, %v161_v52 }
 0x13f   :  { %v153_v57 = vsub.f32 1.5, %v152_v55 }
 0x140   :  { %v453_v58 = vadd.f32 %v310_v54, %v167_v56 }
 0x141   :  { %v154_v59 = vmul.f32 %v314_v46, %v153_v57 }
 0x142   :  { %v456_v60 = vmul.f32 0.70710677, %v453_v58 }
 0x143   :  { %v158_v62 = vsel %vm157_vm5, %v314_v46, %v154_v59 }
 0x144   :  { %v179_v63 = vmul.f32 %v456_v60, %v456_v60  ;;  %v162_v0 = vmul.f32 %v160_v61, %v158_v62 }
 0x146   :  { %v180_v1 = vmin.f32 %v179_v63, 16.0  ;;  %v168_v2 = vmul.f32 %v309_v49, %v162_v0 }
 0x148   :  { %v181_v3 = vmul.f32 2.1237322e-06, %v180_v1  ;;  %v192_v4 = vmul.f32 3.8918573e-05, %v180_v1  ;;  %v460_v5 = vadd.f32 %v310_v54, %v168_v2 }
 0x14a   :  { %v182_v6 = vadd.f32 0.00028619796, %v181_v3  ;;  %v193_v7 = vadd.f32 0.001143296, %v192_v4  ;;  %v463_v8 = vmul.f32 0.70710677, %v460_v5 }
 0x14b   :  { %v175_v4 = vmul.f32 0.5, %v453_v58  ;;  %v176_v58 = vmul.f32 0.5, %v460_v5 }
 0x14c   :  { %v183_v9 = vmul.f32 %v182_v6, %v180_v1  ;;  %v194_v10 = vmul.f32 %v193_v7, %v180_v1  ;;  %v219_v11 = vmul.f32 %v463_v8, %v463_v8 }
 0x14e   :  { %v195_v12 = vadd.f32 0.014752088, %v194_v10  ;;  %v184_v13 = vadd.f32 0.0036580483, %v183_v9  ;;  %v220_v14 = vmin.f32 %v219_v11, 16.0 }
 0x150   :  { %v196_v15 = vmul.f32 %v195_v12, %v180_v1  ;;  %v221_v16 = vmul.f32 2.1237322e-06, %v220_v14  ;;  %v232_v17 = vmul.f32 3.8918573e-05, %v220_v14  ;;  %v185_v19 = vmul.f32 %v184_v13, %v180_v1 }
 0x152   :  { %v197_v18 = vadd.f32 0.112945676, %v196_v15  ;;  %v222_v20 = vadd.f32 0.00028619796, %v221_v16  ;;  %v233_v21 = vadd.f32 0.001143296, %v232_v17 }
 0x153   :  { %v186_v26 = vadd.f32 0.05243302, %v185_v19 }
 0x154   :  { %v198_v22 = vmul.f32 %v197_v18, %v180_v1  ;;  %v223_v23 = vmul.f32 %v222_v20, %v220_v14  ;;  %v234_v24 = vmul.f32 %v233_v21, %v220_v14 }
 0x155   :  { %v187_v32 = vmul.f32 %v186_v26, %v180_v1 }
 0x156   :  { %v199_v25 = vadd.f32 0.4994258, %v198_v22  ;;  %v235_v27 = vadd.f32 0.014752088, %v234_v24  ;;  %v224_v29 = vadd.f32 0.0036580483, %v223_v23 }
 0x157   :  { %v188_v36 = vadd.f32 0.18741608, %v187_v32 }
 0x158   :  { %v200_v28 = vmul.f32 %v199_v25, %v180_v1  ;;  %v236_v30 = vmul.f32 %v235_v27, %v220_v14  ;;  %v225_v34 = vmul.f32 %v224_v29, %v220_v14 }
 0x159   :  { %v189_v41 = vmul.f32 %v188_v36, %v180_v1 }
 0x15a   :  { %v201_v31 = vadd.f32 1.0, %v200_v28  ;;  %v237_v33 = vadd.f32 0.112945676, %v236_v30  ;;  %v226_v38 = vadd.f32 0.05243302, %v225_v34 }
 0x15b   :  { %v190_v47 = vadd.f32 1.1283791, %v189_v41 }
 0x15c   :  { %315 = vrcp.f32 %v201_v31  ;;  %v238_v35 = vmul.f32 %v237_v33, %v220_v14  ;;  %v227_v44 = vmul.f32 %v226_v38, %v220_v14  ;;  %v213_v46 = vand.u32 2147483648, %v201_v31 }
 0x15d   :  { %v211_v49 = vand.u32 2147483647, %v201_v31  ;;  %vm207_vm7 = vweird.f32 %v201_v31  ;;  %v191_v54 = vmul.f32 %v190_v47, %v456_v60 }
 0x15e   :  { %v239_v37 = vadd.f32 0.4994258, %v238_v35  ;;  %v228_v50 = vadd.f32 0.18741608, %v227_v44  ;;  %v214_v52 = vor.u32 1.1754944e-38, %v213_v46 }
 0x15f   :  { %vm212_vm9 = vcmp.eq.f32.partialorder %v211_v49, 8.507059e+37 }
 0x160   :  { %v240_v39 = vmul.f32 %v239_v37, %v220_v14  ;;  %v229_v57 = vmul.f32 %v228_v50, %v220_v14 }
 0x162   :  { %v316_v40 = vpop.eup %315  ;;  %v241_v43 = vadd.f32 1.0, %v240_v39  ;;  %v230_v1 = vadd.f32 1.1283791, %v229_v57 }
 0x163   :  { %v203_v42 = vmul.f32 %v316_v40, %v201_v31  ;;  %vm208_vm6 = vweird.f32 %v316_v40 }
 0x164   :  { %317 = vrcp.f32 %v241_v43  ;;  %vm209_vm8 = vmor %vm207_vm7, %vm208_vm6  ;;  %v253_v0 = vand.u32 2147483648, %v241_v43  ;;  %v251_v3 = vand.u32 2147483647, %v241_v43  ;;  %vm247_vm11 = vweird.f32 %v241_v43 }
 0x165   :  { %v204_v45 = vsub.f32 1.0, %v203_v42  ;;  %v231_v10 = vmul.f32 %v230_v1, %v463_v8 }
 0x166   :  { %v254_v60 = vor.u32 1.1754944e-38, %v253_v0  ;;  %vm252_vm13 = vcmp.eq.f32.partialorder %v251_v3, 8.507059e+37 }
 0x167   :  { %v205_v48 = vmul.f32 %v316_v40, %v204_v45 }
 0x169   :  { %v206_v51 = vadd.f32 %v316_v40, %v205_v48 }
 0x16a   :  { %v318_v53 = vpop.eup %317 }
 0x16b   :  { %v210_v55 = vsel %vm209_vm8, %v316_v40, %v206_v51  ;;  %v243_v59 = vmul.f32 %v318_v53, %v241_v43  ;;  %vm248_vm10 = vweird.f32 %v318_v53 }
 0x16c   :  { %v215_v56 = vsel %vm212_vm9, %v214_v52, %v210_v55  ;;  %vm249_vm12 = vmor %vm247_vm11, %vm248_vm10 }
 0x16d   :  { %v216_v61 = vmul.f32 %v215_v56, %v191_v54  ;;  %v244_v62 = vsub.f32 1.0, %v243_v59 }
 0x16f   :  { %v285_v63 = vclamps-f32 %v216_v61, 1.0  ;;  %v245_v2 = vmul.f32 %v318_v53, %v244_v62 }
 0x171   :  { %v259_v6 = vadd.f32 1.0, %v285_v63  ;;  %v246_v7 = vadd.f32 %v318_v53, %v245_v2 }
 0x173   :  { %v261_v9 = vmul.f32 %v259_v6, %v175_v4  ;;  %v250_v11 = vsel %vm249_vm12, %v318_v53, %v246_v7 }
 0x174   :  { %v255_v12 = vsel %vm252_vm13, %v254_v60, %v250_v11 }
 0x175   :  { %263 = vst [vmem:[#allocation8] sm:$0xff] %v261_v9  ;;  %v256_v13 = vmul.f32 %v255_v12, %v231_v10 }
 0x177   :  { %v286_v14 = vclamps-f32 %v256_v13, 1.0 }
 0x179   :  { %v260_v15 = vadd.f32 1.0, %v286_v14 }
 0x17b   :  { %v262_v16 = vmul.f32 %v260_v15, %v176_v58 }
 0x17d   :  { %264 = vst [vmem:[#allocation8 + $0x8] sm:$0xff] %v262_v16 }
 0x17e   :  { %277 = dma.vmem_to_hbm [thread:$0]  %s270_s4, 256, %s272_s10, [#allocation5], %s398_s26, %s398_s26, %s399_s27  }
 0x17f   :  { %395 = dma.done.wait [#allocation5], 256  }
 0x180   :  { %396 = vsyncadd [#allocation5], 4294967040 }
 0x181   :  { %282 = vsyncpa [#allocation4], 1 }
 0x182   :  { %283 = vsyncpa [#allocation7], 1 }
 0x183   :  { %284 = vsyncpa [#allocation5], 1 }

</bundles_post_ra>
